<compile_context>
chip_gen: v7x
topology: tpu7x:2x2x1
jax: 0.10.0
libtpu: 0.0.40
codegen_flags: <defaults>
</compile_context>

<pallas_src>
import functools
import math

import numpy as np
import jax
import jax.numpy as jnp
from jax import lax
from jax.experimental import pallas as pl
from jax.experimental.pallas import tpu as pltpu

_HALO = 128  # right-halo width (lanes); requires kernel_size - 1 <= 128


def _round_up(x, m):
    return ((x + m - 1) // m) * m


# ----------------------------------------------------------------------------
# ConvTranspose1dELR hot-path kernel:
#   out(C_out, T) = sum_k  Wk(C_out, C_in) @ x_window[:, k:k+T]  + bias, act
# ----------------------------------------------------------------------------
def _convt1d_kernel(w_ref, xc_ref, xh_ref, b_ref, o_ref, *, ntaps, neg_slope):
    # w_ref  : (K, C_out, C_in) bf16  -- k-flipped, demod/gain-folded taps (constant)
    # xc_ref : (1, C_in, T)     bf16  -- zero-inserted / padded x window for this tile
    # xh_ref : (1, C_in, 128)   bf16  -- right halo (first 128 cols of next tile)
    # b_ref  : (C_out, 1|T)     f32   -- channel or spatial bias
    # o_ref  : (1, C_out, T)
    t_width = o_ref.shape[2]
    xcat = jnp.concatenate([xc_ref[0], xh_ref[0]], axis=-1)      # (C_in, T + 128)
    acc = jnp.dot(w_ref[0], xcat[:, :t_width],
                  preferred_element_type=jnp.float32)            # (C_out, T) f32
    for k in range(1, ntaps):
        acc = acc + jnp.dot(w_ref[k], xcat[:, k:k + t_width],
                            preferred_element_type=jnp.float32)
    acc = acc + b_ref[...]                                       # broadcast over lanes
    if neg_slope is not None:
        acc = jnp.where(acc >= 0.0, acc, acc * neg_slope)
    o_ref[0] = acc.astype(o_ref.dtype)


def conv_transpose1d_elr_forward(x, weight, bias, *, stride, padding, weightgain,
                                 demod, neg_slope, style=None,
                                 out_dtype=jnp.float32):
    B, C_in, L = x.shape
    _, C_out, K = weight.shape
    if padding > K - 1:
        # TODO(synk): support output cropping for padding > kernel_size - 1.
        raise NotImplementedError("padding > kernel_size - 1 not supported")
    assert K - 1 <= _HALO, "kernel_size larger than supported halo width"
    s = int(stride)
    L_out = (L - 1) * s + K - 2 * padding
    pp = K - 1 - padding                       # left edge pad of the dilated input
    Lu = (L - 1) * s + 1                       # zero-inserted length
    gain = float(weightgain)

    x = x.astype(jnp.float32)
    weight = weight.astype(jnp.float32)

    # ---- fold modulation / demodulation into a per-(b,i) x scale and a STATIC weight
    if style is not None:
        m = style.astype(jnp.float32) * 0.1 + 1.0                      # (B, C_in)
        if demod:
            # F.normalize over dims (batch, outch) of the modulated 4-D weight is
            # separable:  denom[i,k] = sqrt(sum_o W[i,o,k]^2 * sum_b m[b,i]^2).
            sumsq_o = jnp.sum(weight * weight, axis=1)                 # (C_in, K)
            sumsq_b = jnp.sum(m * m, axis=0)                           # (C_in,)
            denom = jnp.maximum(jnp.sqrt(sumsq_o * sumsq_b[:, None]), 1e-12)
            w_eff = gain * weight / denom[:, None, :]                  # (C_in, C_out, K)
        else:
            w_eff = gain * weight
        x = x * m[:, :, None]            # per-sample modulation rides on x (cheap, fused)
    else:
        if demod:
            denom_o = jnp.maximum(
                jnp.sqrt(jnp.sum(weight * weight, axis=(0, 2))), 1e-12)  # (C_out,)
            w_eff = gain * weight / denom_o[None, :, None]
        else:
            w_eff = gain * weight

    # correlation-form taps: wk[k', o, i] = w_eff[i, o, K-1-k']  (k flip), bf16 for MXU
    wk = jnp.transpose(w_eff, (2, 1, 0))[::-1].astype(jnp.bfloat16)    # (K, C_out, C_in)

    bias = bias.astype(jnp.float32)
    spatial_bias = bias.ndim == 2 and bias.shape[1] > 1

    # ---- tile-size selection (generation aware: 128 MiB v5e/v6e vs 64 MiB v7x)
    try:
        vmem_phys = int(pltpu.get_tpu_info().vmem_capacity_bytes)
    except Exception:
        vmem_phys = 128 * 1024 * 1024
    budget = int(vmem_phys * 0.4)
    fixed = 2 * K * C_out * C_in * 2 + 2 * C_in * _HALO * 2 + 2 * C_out * 4
    per_t = 2 * (C_in * 2 + C_out * 4) + (2 * C_out * 4 if spatial_bias else 0)
    t_budget = max(128, ((budget - fixed) // max(per_t, 1)) // 128 * 128)
    cap = 2048 if vmem_phys >= (100 << 20) else 512
    T = max(128, min(cap, _round_up(L_out, 128), t_budget) // 128 * 128)
    if L_out % 128 == 0:
        # pick a tile that divides L_out so the trailing slice copy is skipped
        tc = T
        while tc > 128 and L_out % tc != 0:
            tc -= 128
        T = tc
    L_pad = _round_up(L_out, T)
    NT = L_pad // T
    Lx = L_pad + T                      # extra zero tail so cur/halo blocks never run out

    # ---- zero-insertion (stride) + edge pads in ONE fused lax.pad, bf16 in HBM.
    right_pad = Lx - pp - Lu
    x_pad = lax.pad(x, jnp.array(0.0, jnp.float32),
                    ((0, 0, 0), (0, 0, 0), (pp, right_pad, s - 1)))
    x_pad = x_pad.astype(jnp.bfloat16)                                  # (B, C_in, Lx)

    if bias.ndim == 1:
        bias_arr = bias[:, None]                                        # (C_out, 1)
        bias_spec = pl.BlockSpec((C_out, 1), lambda b, t: (0, 0))
    elif bias.shape[1] == 1:
        bias_arr = bias
        bias_spec = pl.BlockSpec((C_out, 1), lambda b, t: (0, 0))
    else:
        assert bias.shape[1] == L_out, "ub spatial bias must match output length"
        bias_arr = jnp.pad(bias, ((0, 0), (0, L_pad - L_out)))
        bias_spec = pl.BlockSpec((C_out, T), lambda b, t: (0, t))

    halo_ratio = T // _HALO
    vmem_limit = int(min(vmem_phys * 3 // 4, 128 * 1024 * 1024))

    out = pl.pallas_call(
        functools.partial(_convt1d_kernel, ntaps=K, neg_slope=neg_slope),
        grid=(B, NT),
        in_specs=[
            pl.BlockSpec((K, C_out, C_in), lambda b, t: (0, 0, 0)),        # taps (const)
            pl.BlockSpec((1, C_in, T), lambda b, t: (b, 0, t)),            # x window
            pl.BlockSpec((1, C_in, _HALO),
                         lambda b, t: (b, 0, (t + 1) * halo_ratio)),       # right halo
            bias_spec,
        ],
        out_specs=pl.BlockSpec((1, C_out, T), lambda b, t: (b, 0, t)),
        out_shape=jax.ShapeDtypeStruct((B, C_out, L_pad), out_dtype),
        compiler_params=pltpu.CompilerParams(
            dimension_semantics=("parallel", "parallel"),
            vmem_limit_bytes=vmem_limit),
    )(wk, x_pad, x_pad, bias_arr)

    if L_pad != L_out:
        out = out[:, :, :L_out]
    return out


# ----------------------------------------------------------------------------
# Module wrapper (parameter setup mirrors the PyTorch __init__)
# ----------------------------------------------------------------------------
def _calculate_gain(act, neg_slope=None):
    if act == "leaky_relu":
        return math.sqrt(2.0 / (1.0 + neg_slope ** 2))
    if act == "relu":
        return math.sqrt(2.0)
    return 1.0


class ConvTranspose1dELRPallas:
    def __init__(self, inch, outch, kernel_size, stride, padding, wsize=0,
                 affinelrmult=1.0, norm=None, ub=None, act=None, key=None):
        self.inch, self.outch = inch, outch
        self.kernel_size, self.stride, self.padding = kernel_size, stride, padding
        self.wsize, self.norm, self.ub = wsize, norm, ub

        if act is None:
            self.neg_slope = None
            actgain = 1.0
        elif act[0] == "leaky_relu":
            self.neg_slope = float(act[1])
            actgain = _calculate_gain("leaky_relu", self.neg_slope)
        elif act[0] == "relu":
            self.neg_slope = 0.0
            actgain = _calculate_gain("relu")
        else:
            self.neg_slope = None
            actgain = 1.0

        fan_in = inch * (kernel_size / stride)
        initgain = stride ** 0.5 if norm == "demod" else 1.0 / math.sqrt(fan_in)
        self.weightgain = actgain * initgain

        k1, k2 = jax.random.split(key, 2)
        # blockinit: base taps of size K//stride, each repeated `stride` times
        base = jax.random.normal(k1, (inch, outch, kernel_size // stride), jnp.float32)
        self.weight = jnp.repeat(base, stride, axis=2)              # (inch, outch, K)

        if ub is not None:
            self.bias = jnp.zeros((outch, ub[0]), jnp.float32)
        else:
            self.bias = jnp.zeros((outch,), jnp.float32)

        if wsize > 0:
            # LinearELR(wsize, inch, lrmult=affinelrmult), norm=None, act=None
            self.affine_w = jax.random.normal(k2, (inch, wsize), jnp.float32) / affinelrmult
            self.affine_b = jnp.zeros((inch,), jnp.float32)
            self.affine_gain = 1.0 * (1.0 / math.sqrt(wsize)) * affinelrmult
        else:
            self.affine_w = None
            self.affine_b = None
            self.affine_gain = None

    def __call__(self, x, w=None):
        if self.affine_w is not None and w is not None:
            # tiny (B, wsize) x (wsize, inch) projection: plain jnp.dot in glue
            style = (jnp.dot(w.astype(jnp.float32), self.affine_w.T,
                             precision=lax.Precision.HIGHEST) * self.affine_gain
                     + self.affine_b[None, :])
        else:
            style = None
        return conv_transpose1d_elr_forward(
            x, self.weight, self.bias,
            stride=self.stride, padding=self.padding,
            weightgain=self.weightgain, demod=(self.norm == "demod"),
            neg_slope=self.neg_slope, style=style)


# ----------------------------------------------------------------------------
# Pure-JAX reference (mirrors the PyTorch forward) for a correctness check
# ----------------------------------------------------------------------------
def reference_forward(layer, x, w=None):
    B, C_in, L = x.shape
    K, s, p = layer.kernel_size, layer.stride, layer.padding
    C_out = layer.outch
    if layer.affine_w is not None and w is not None:
        aff = jnp.dot(w, layer.affine_w.T, precision=lax.Precision.HIGHEST)
        aff = aff * layer.affine_gain + layer.affine_b[None]
        weight = layer.weight[None] * (aff[:, :, None, None] * 0.1 + 1.0)  # (B,Ci,Co,K)
        if layer.norm == "demod":
            n = jnp.sqrt(jnp.sum(weight ** 2, axis=(0, 2), keepdims=True))
            weight = weight / jnp.maximum(n, 1e-12)
        weight = weight * layer.weightgain
        x_g = x.reshape(1, B * C_in, L)
        rhs = jnp.transpose(weight, (0, 2, 1, 3))[..., ::-1].reshape(B * C_out, C_in, K)
        out = lax.conv_general_dilated(
            x_g, rhs, window_strides=(1,), padding=[(K - 1 - p, K - 1 - p)],
            lhs_dilation=(s,), dimension_numbers=("NCH", "OIH", "NCH"),
            feature_group_count=B, precision=lax.Precision.HIGHEST)
        out = out.reshape(B, C_out, out.shape[-1])
    else:
        weight = layer.weight
        if layer.norm == "demod":
            n = jnp.sqrt(jnp.sum(weight ** 2, axis=(0, 2), keepdims=True))
            weight = weight / jnp.maximum(n, 1e-12)
        weight = weight * layer.weightgain
        rhs = jnp.transpose(weight, (1, 0, 2))[..., ::-1]
        out = lax.conv_general_dilated(
            x, rhs, window_strides=(1,), padding=[(K - 1 - p, K - 1 - p)],
            lhs_dilation=(s,), dimension_numbers=("NCH", "OIH", "NCH"),
            precision=lax.Precision.HIGHEST)
    if layer.bias.ndim == 1:
        out = out + layer.bias[None, :, None]
    else:
        out = out + layer.bias[None]
    if layer.neg_slope is not None:
        out = jnp.where(out >= 0, out, out * layer.neg_slope)
    return out


if __name__ == "__main__":
    key = jax.random.PRNGKey(0)
    kx, kw, kp, kp2, kp3, kb = jax.random.split(key, 6)

    B, C_in, C_out, L, K, stride, padding, wsize = 2, 4, 8, 16, 4, 2, 1, 8
    x = jax.random.normal(kx, (B, C_in, L), jnp.float32)
    w_style = jax.random.normal(kw, (B, wsize), jnp.float32)

    # 1) modulated + demod + leaky_relu, stride 2
    layer = ConvTranspose1dELRPallas(
        inch=C_in, outch=C_out, kernel_size=K, stride=stride, padding=padding,
        wsize=wsize, affinelrmult=1.0, norm="demod", ub=None,
        act=("leaky_relu", 0.2), key=kp)
    out = jax.block_until_ready(layer(x, w_style))
    ref = reference_forward(layer, x, w_style)
    # tolerance accounts for bf16 MXU operands vs. f32 HIGHEST reference
    np.testing.assert_allclose(np.asarray(out), np.asarray(ref), rtol=2e-2, atol=5e-2)

    # 2) unmodulated path (no style), demod + plain channel bias, no activation
    layer2 = ConvTranspose1dELRPallas(
        inch=C_in, outch=C_out, kernel_size=K, stride=stride, padding=padding,
        wsize=0, norm="demod", ub=None, act=None, key=kp2)
    out2 = jax.block_until_ready(layer2(x))
    ref2 = reference_forward(layer2, x)
    np.testing.assert_allclose(np.asarray(out2), np.asarray(ref2), rtol=2e-2, atol=5e-2)

    # 3) stride-1 + spatial (ub) bias + relu + modulation without demod
    layer3 = ConvTranspose1dELRPallas(
        inch=C_in, outch=C_out, kernel_size=3, stride=1, padding=1,
        wsize=wsize, affinelrmult=2.0, norm=None, ub=(16,), act=("relu",), key=kp3)
    layer3.bias = 0.1 * jax.random.normal(kb, (C_out, 16), jnp.float32)
    out3 = jax.block_until_ready(layer3(x, w_style))
    ref3 = reference_forward(layer3, x, w_style)
    np.testing.assert_allclose(np.asarray(out3), np.asarray(ref3), rtol=2e-2, atol=5e-2)

    print("KERNEL_OK")
</pallas_src>

<mosaic_0001>
module attributes {stable_mosaic.version = 11 : i64} {
  func.func @_convt1d_kernel(%arg0: i32, %arg1: i32, %arg2: memref<4x8x4xbf16, #tpu.memory_space<vmem>>, %arg3: memref<1x4x128xbf16, #tpu.memory_space<vmem>>, %arg4: memref<1x4x128xbf16, #tpu.memory_space<vmem>>, %arg5: memref<8x1xf32, #tpu.memory_space<vmem>>, %arg6: memref<1x8x128xf32, #tpu.memory_space<vmem>>) attributes {dimension_semantics = [#tpu.dimension_semantics<parallel>, #tpu.dimension_semantics<parallel>], iteration_bounds = array<i64: 2, 1>, scalar_prefetch = 0 : i64, scratch_operands = 0 : i64, tpu.core_type = #tpu.core_type<tc>, window_params = [{pipeline_mode = #tpu.pipeline_mode<synchronous>, transform_indices = @transform_0, window_bounds = array<i64: 4, 8, 4>}, {transform_indices = @transform_1, window_bounds = array<i64: 1, 4, 128>}, {transform_indices = @transform_2, window_bounds = array<i64: 1, 4, 128>}, {pipeline_mode = #tpu.pipeline_mode<synchronous>, transform_indices = @transform_3, window_bounds = array<i64: 8, 1>}, {transform_indices = @transform_4, window_bounds = array<i64: 1, 8, 128>}]} {
    %c0 = arith.constant 0 : index
    %c0_0 = arith.constant 0 : index
    %c0_1 = arith.constant 0 : index
    %0 = vector.load %arg3[%c0, %c0_0, %c0_1] : memref<1x4x128xbf16, #tpu.memory_space<vmem>>, vector<1x4x128xbf16>
    %1 = vector.shape_cast %0 : vector<1x4x128xbf16> to vector<4x128xbf16>
    %c0_2 = arith.constant 0 : index
    %c0_3 = arith.constant 0 : index
    %c0_4 = arith.constant 0 : index
    %2 = vector.load %arg4[%c0_2, %c0_3, %c0_4] : memref<1x4x128xbf16, #tpu.memory_space<vmem>>, vector<1x4x128xbf16>
    %3 = vector.shape_cast %2 : vector<1x4x128xbf16> to vector<4x128xbf16>
    %4 = tpu.concatenate %1, %3 in 1 : vector<4x128xbf16>, vector<4x128xbf16> -> vector<4x256xbf16>
    %c0_5 = arith.constant 0 : index
    %c0_6 = arith.constant 0 : index
    %c0_7 = arith.constant 0 : index
    %5 = vector.load %arg2[%c0_5, %c0_6, %c0_7] : memref<4x8x4xbf16, #tpu.memory_space<vmem>>, vector<1x8x4xbf16>
    %6 = vector.shape_cast %5 : vector<1x8x4xbf16> to vector<8x4xbf16>
    %7 = vector.extract_strided_slice %4 {offsets = [0, 0], sizes = [4, 128], strides = [1, 1]} : vector<4x256xbf16> to vector<4x128xbf16>
    %cst = arith.constant dense<0.000000e+00> : vector<8x128xf32>
    %8 = tpu.matmul %6, %7, %cst {dimension_numbers = #tpu.dot_dimension_numbers<[1], [0], [0], [1], [0, 0, 1, 1], [], []>} : vector<8x4xbf16>, vector<4x128xbf16>, vector<8x128xf32> -> vector<8x128xf32>
    %c1 = arith.constant 1 : index
    %c0_8 = arith.constant 0 : index
    %c0_9 = arith.constant 0 : index
    %9 = vector.load %arg2[%c1, %c0_8, %c0_9] : memref<4x8x4xbf16, #tpu.memory_space<vmem>>, vector<1x8x4xbf16>
    %10 = vector.shape_cast %9 : vector<1x8x4xbf16> to vector<8x4xbf16>
    %11 = vector.extract_strided_slice %4 {offsets = [0, 1], sizes = [4, 128], strides = [1, 1]} : vector<4x256xbf16> to vector<4x128xbf16>
    %cst_10 = arith.constant dense<0.000000e+00> : vector<8x128xf32>
    %12 = tpu.matmul %10, %11, %cst_10 {dimension_numbers = #tpu.dot_dimension_numbers<[1], [0], [0], [1], [0, 0, 1, 1], [], []>} : vector<8x4xbf16>, vector<4x128xbf16>, vector<8x128xf32> -> vector<8x128xf32>
    %13 = arith.addf %8, %12 : vector<8x128xf32>
    %c2 = arith.constant 2 : index
    %c0_11 = arith.constant 0 : index
    %c0_12 = arith.constant 0 : index
    %14 = vector.load %arg2[%c2, %c0_11, %c0_12] : memref<4x8x4xbf16, #tpu.memory_space<vmem>>, vector<1x8x4xbf16>
    %15 = vector.shape_cast %14 : vector<1x8x4xbf16> to vector<8x4xbf16>
    %16 = vector.extract_strided_slice %4 {offsets = [0, 2], sizes = [4, 128], strides = [1, 1]} : vector<4x256xbf16> to vector<4x128xbf16>
    %cst_13 = arith.constant dense<0.000000e+00> : vector<8x128xf32>
    %17 = tpu.matmul %15, %16, %cst_13 {dimension_numbers = #tpu.dot_dimension_numbers<[1], [0], [0], [1], [0, 0, 1, 1], [], []>} : vector<8x4xbf16>, vector<4x128xbf16>, vector<8x128xf32> -> vector<8x128xf32>
    %18 = arith.addf %13, %17 : vector<8x128xf32>
    %c3 = arith.constant 3 : index
    %c0_14 = arith.constant 0 : index
    %c0_15 = arith.constant 0 : index
    %19 = vector.load %arg2[%c3, %c0_14, %c0_15] : memref<4x8x4xbf16, #tpu.memory_space<vmem>>, vector<1x8x4xbf16>
    %20 = vector.shape_cast %19 : vector<1x8x4xbf16> to vector<8x4xbf16>
    %21 = vector.extract_strided_slice %4 {offsets = [0, 3], sizes = [4, 128], strides = [1, 1]} : vector<4x256xbf16> to vector<4x128xbf16>
    %cst_16 = arith.constant dense<0.000000e+00> : vector<8x128xf32>
    %22 = tpu.matmul %20, %21, %cst_16 {dimension_numbers = #tpu.dot_dimension_numbers<[1], [0], [0], [1], [0, 0, 1, 1], [], []>} : vector<8x4xbf16>, vector<4x128xbf16>, vector<8x128xf32> -> vector<8x128xf32>
    %23 = arith.addf %18, %22 : vector<8x128xf32>
    %c0_17 = arith.constant 0 : index
    %c0_18 = arith.constant 0 : index
    %24 = vector.load %arg5[%c0_17, %c0_18] : memref<8x1xf32, #tpu.memory_space<vmem>>, vector<8x1xf32>
    %25 = vector.broadcast %24 : vector<8x1xf32> to vector<8x128xf32>
    %26 = arith.addf %23, %25 : vector<8x128xf32>
    %cst_19 = arith.constant 0.000000e+00 : f32
    %27 = vector.broadcast %cst_19 : f32 to vector<8x128xf32>
    %28 = arith.cmpf oge, %26, %27 : vector<8x128xf32>
    %cst_20 = arith.constant 2.000000e-01 : f32
    %29 = vector.broadcast %cst_20 : f32 to vector<8x128xf32>
    %30 = arith.mulf %26, %29 : vector<8x128xf32>
    %31 = arith.select %28, %26, %30 : vector<8x128xi1>, vector<8x128xf32>
    %c0_21 = arith.constant 0 : index
    %c0_22 = arith.constant 0 : index
    %c0_23 = arith.constant 0 : index
    %32 = vector.load %arg6[%c0_21, %c0_22, %c0_23] : memref<1x8x128xf32, #tpu.memory_space<vmem>>, vector<1x8x128xf32>
    %33 = vector.shape_cast %32 : vector<1x8x128xf32> to vector<8x128xf32>
    %34 = vector.shape_cast %31 : vector<8x128xf32> to vector<1x8x128xf32>
    tpu.vector_store %arg6[%c0_21, %c0_22, %c0_23], %34 {strides = array<i32>} : memref<1x8x128xf32, #tpu.memory_space<vmem>>, vector<1x8x128xf32>,
    return
  }
  func.func @transform_0(%arg0: i32, %arg1: i32) -> (i32, i32, i32) {
    %c0_i32 = arith.constant 0 : i32
    %c0_i32_0 = arith.constant 0 : i32
    %c0_i32_1 = arith.constant 0 : i32
    %c0_i32_2 = arith.constant 0 : i32
    return %c0_i32, %c0_i32_0, %c0_i32_1 : i32, i32, i32
  }
  func.func @transform_1(%arg0: i32, %arg1: i32) -> (i32, i32, i32) {
    %c0_i32 = arith.constant 0 : i32
    %c0_i32_0 = arith.constant 0 : i32
    return %arg0, %c0_i32, %arg1 : i32, i32, i32
  }
  func.func @transform_2(%arg0: i32, %arg1: i32) -> (i32, i32, i32) {
    %c1_i32 = arith.constant 1 : i32
    %0 = arith.addi %arg1, %c1_i32 : i32
    %c1_i32_0 = arith.constant 1 : i32
    %1 = arith.muli %0, %c1_i32_0 : i32
    %c0_i32 = arith.constant 0 : i32
    %c0_i32_1 = arith.constant 0 : i32
    return %arg0, %c0_i32, %1 : i32, i32, i32
  }
  func.func @transform_3(%arg0: i32, %arg1: i32) -> (i32, i32) {
    %c0_i32 = arith.constant 0 : i32
    %c0_i32_0 = arith.constant 0 : i32
    %c0_i32_1 = arith.constant 0 : i32
    return %c0_i32, %c0_i32_0 : i32, i32
  }
  func.func @transform_4(%arg0: i32, %arg1: i32) -> (i32, i32, i32) {
    %c0_i32 = arith.constant 0 : i32
    %c0_i32_0 = arith.constant 0 : i32
    return %arg0, %c0_i32, %arg1 : i32, i32, i32
  }
}

</mosaic_0001>

<bundles_post_ra>
// kernel: tpu_custom_call.1
= control target key start
LH: loop header
LB: loop body
LE: loop exit
PB: predicated region body
PF: predicated region fallthrough
CT: control target
= control target key end

     0   :  { %s1386_s0 = inlined_call_operand.hbm [shape: bf16[4,8,4], index: 0, kind: input, shape index: {}]   ;;  %s1387_s1 = inlined_call_operand.hbm [shape: bf16[2,4,256], index: 1, kind: input, shape index: {}]   ;;  %s1388_s2 = inlined_call_operand.hbm [shape: bf16[2,4,256], index: 2, kind: input, shape index: {}]   ;;  %s1389_s3 = inlined_call_operand.hbm [shape: f32[8,1], index: 3, kind: input, shape index: {}]   ;;  %s1390_s4 = inlined_call_operand.hbm [shape: f32[2,8,128], index: 4, kind: output, shape index: {}]  }
   0x1   :  { %1400 = sst [smem:[#allocation20_spill]] %s1387_s1 }
   0x2   :  { %9 = vsyncpa [#allocation3], 0 }
   0x3   :  { %10 = vsyncpa [#allocation6], 0 }
   0x4   :  { %12 = vsyncpa [#allocation6 + $0x1], 0 }
   0x5   :  { %13 = vsyncpa [#allocation9], 0 }
   0x6   :  { %14 = vsyncpa [#allocation4], 0 }
   0x7   :  { %16 = vsyncpa [#allocation4 + $0x1], 0  ;;  %s1075_s15 = smov 0   ;;  %s1077_s16 = smov 0  }
   0x8   :  { %s1079_s17 = smov 0   ;;  %s1081_s18 = smov 0  }
   0x9   :  { %s1083_s19 = smov 0   ;;  %s1085_s20 = smov 0  }
   0xa LB: > { %1401 = sst [smem:[#allocation15_spill]] %s1023_s17  ;;  %s34_s21 = sadd.s32 1, %s1031_s19  ;;  %s1035_s20 = sphi %s1085_s20, %s22_s20   ;;  %s1031_s19 = sphi %s1083_s19, %s1427_s19   ;;  %s1027_s18 = sphi %s1081_s18, %s1426_s18   ;;  %s1023_s17 = sphi %s1079_s17, %s1425_s17   ;;  %s1019_s16 = sphi %s1077_s16, %s1429_s16   ;;  %s1015_s15 = sphi %s1075_s15, %s1428_s15  }
   0xb   : > { %1402 = sst [smem:[#allocation16_spill]] %s1031_s19  ;;  %s64_s22 = sadd.s32 1, %s1023_s17 }
   0xc   : > { %1403 = sst [smem:[#allocation17_spill]] %s1035_s20  ;;  %p36_p0 = scmp.ge.s32.totalorder %s34_s21, 2 }
   0xd   : > { %p71_p1 = scmp.ne.s32.totalorder %s1023_s17, %s1019_s16  ;;  %p72_p2 = scmp.eq.s32.totalorder %s1035_s20, 0 }
   0xe   : > { %s1431_s21 = smov (%p36_p0, %s34_s21), 0  ;;  %p765_p5 = scmp.lt.s32.totalorder %s1035_s20, 2 }
   0xf   : > { %1404 = sst [smem:[#allocation18_spill]] %s1431_s21  ;;  %p73_p4 = por %p72_p2, %p71_p1 }
  0x10   : > { %s59_s23 = ssub.s32 %s1031_s19, %s1431_s21  ;;  %s204_s24 = sand.u32 1, %s1035_s20  }
  0x11   : > { %p62_p6 = scmp.eq.s32.totalorder %s59_s23, 0  ;;  %s206_s25 = sand.u32 1, %s1023_s17  }
  0x12   : > { %s697_s26 = sshll.u32 %s1031_s19, 6  ;;  %s1125_s28 = sshll.u32 %s206_s25, 1 }
  0x13   : > { %s1123_s27 = scalar_select %p62_p6, %s1023_s17, %s64_s22  }
  0x14   : > { %s1406_s1 = sld [smem:[#allocation20_spill]]  ;;  %p1134_p7 = pnand %p765_p5, %p73_p4 }
  0x15   : > { %1405 = sst [smem:[#allocation19_spill]] %s1123_s27  ;;  %s208_s7 = scalar_lea.vmem [#allocation5], %s1125_s28 }
  0x16   : > { %s217_s8 = sshll.u32 %s208_s7, 4  ;;  %s1141_s9 = scalar_lea.sflag [#allocation6], %s204_s24  ;;  %s1139_s8 = int_to_ptr.vmem [resolvable:$true] %s217_s8 }
  0x17   : > { %p1394_p9 = pneg %p1134_p7 }
  0x1a   : > { %s1132_s5 = scalar_lea.hbm %s1406_s1, %s697_s26  ;;  %s833_s13 = scalar_lea.hbm %s1406_s1, 128 }
  0x1b   : > { %s828_s10 = scalar_lea.hbm %s1132_s5, 32  ;;  %p834_p12 = scmp.lt.u32.totalorder %s1132_s5, %s1406_s1 }
  0x1c   : > { %p829_p8 = scmp.ne.s32.totalorder %s1132_s5, %s828_s10  ;;  %p835_p13 = scmp.lt.u32.totalorder %s833_s13, %s828_s10 }
  0x1d   : > { %p837_p2 = scmp.lt.u32.totalorder %s828_s10, %s1132_s5 }
  0x1e   : > { %p831_p10 = pnand %p1394_p9, %p829_p8  ;;  %p836_p0 = por %p835_p13, %p834_p12 }
  0x20   : > { %p832_p11 = pneg %p831_p10  ;;  %p838_p4 = por %p837_p2, %p836_p0 }
  0x22   : > { %p839_p5 = pnand %p838_p4, %p832_p11 }
  0x24   : > { %842 = shalt.err (!%p839_p5)
}
  0x25   : > { %s843_s23 = scalar_lea.vmem %s1139_s8, 32  ;;  %s1037_s24 = smov [#allocation5]  }
  0x26   : > { %p844_p6 = scmp.ne.s32.totalorder %s1139_s8, %s843_s23  ;;  %s848_s25 = sshll.u32 %s1037_s24, 4  ;;  %s849_s25 = int_to_ptr.vmem [resolvable:$false] %s848_s25 }
  0x27   : > { %s850_s29 = scalar_lea.vmem %s849_s25, 64  ;;  %p851_p3 = scmp.lt.s32.totalorder %s1139_s8, %s849_s25 }
  0x28   : > { %p846_p8 = pnand %p844_p6, %p1394_p9  ;;  %p852_p12 = scmp.lt.s32.totalorder %s850_s29, %s843_s23 }
  0x2a   : > { %p847_p10 = pneg %p846_p8  ;;  %p853_p13 = por %p852_p12, %p851_p3 }
  0x2c   : > { %p854_p0 = pnand %p853_p13, %p847_p10 }
  0x2e   : > { %857 = shalt.err (!%p854_p0)
}
  0x2f   : > { %755 = dma.hbm_to_vmem [thread:$0]  (!%p1134_p7), %s1132_s5, 32, %s1139_s8, %s1141_s9  }
  0x30   : > { %s1174_s10 = scalar_lea.hbm %s1388_s2, %s697_s26  ;;  %s1177_s11 = sadd.s32 4294967295, %s1035_s20  }
  0x31   : > { %s672_s12 = sadd.s32 4294967294, %s1035_s20   ;;  %p77_p3 = scmp.ne.s32.totalorder %s1019_s16, %s1015_s15 }
  0x32   : > { %p1393_p11 = scmp.eq.s32.totalorder %s1177_s11, 0  ;;  %p154_p2 = scmp.eq.s32.totalorder %s1177_s11, 1 }
  0x33   : > { %p160_p4 = scmp.eq.s32.totalorder %s672_s12, 1  ;;  %p673_p5 = scmp.ge.s32.totalorder %s1035_s20, 1 }
  0x34   : > { %p1187_p6 = por %p1393_p11, %p77_p3  ;;  %p1194_p8 = por %p154_p2, %p71_p1 }
  0x35   : > { %p1198_p10 = por %p160_p4, %p77_p3  ;;  %p167_p12 = scmp.lt.s32.totalorder %s1035_s20, 3 }
  0x36   : > { %s1408_s5 = scalar_select %p1187_p6, 1, 0 }
  0x37   : > { %s1409_s26 = scalar_select %p1194_p8, 1, 0 }
  0x38   : > { %s1410_s8 = scalar_select %p1198_p10, 1, 0 }
  0x39   : > { %p1203_p13 = pnand %p673_p5, %p167_p12  ;;  %s1038_s14 = smov [#allocation2]  }
  0x3a   : > { %s179_s22 = sshll.u32 %s1038_s14, 4  ;;  %s1212_s23 = scalar_lea.hbm %s1174_s10, 32  ;;  %s1207_s22 = int_to_ptr.vmem [resolvable:$true] %s179_s22 }
  0x3b   : > { %p745_p0 = pneg %p1203_p13  ;;  %s1039_s25 = smov [#allocation8]  }
  0x3c   : > { %s193_s29 = sshll.u32 %s1039_s25, 4  ;;  %s228_s30 = scalar_lea.vmem [#allocation7], %s1125_s28  ;;  %s1220_s29 = int_to_ptr.vmem [resolvable:$true] %s193_s29 }
  0x3d   : > { %p1216_p1 = pnand %p745_p0, %p1393_p11  ;;  %s238_s7 = sshll.u32 %s228_s30, 4  ;;  %s1223_s7 = int_to_ptr.vmem [resolvable:$true] %s238_s7 }
  0x3e   : > { %s858_s1 = scalar_lea.hbm %s1386_s0, 256 }
  0x3f   : > { %p859_p3 = scmp.ne.s32.totalorder %s1386_s0, %s858_s1  ;;  %p860_p2 = pneg %p1216_p1 }
  0x40   : > { %p865_p12 = scmp.lt.u32.totalorder %s858_s1, %s1386_s0 }
  0x41   : > { %p861_p4 = pnand %p860_p2, %p859_p3 }
  0x43   : > { %p862_p5 = pneg %p861_p4 }
  0x45   : > { %p867_p0 = pnand %p865_p12, %p862_p5 }
  0x47   : > { %870 = shalt.err (!%p867_p0)
}
  0x48   : > { %s871_s28 = scalar_lea.vmem %s1207_s22, 256  ;;  %p879_p8 = scmp.lt.s32.totalorder %s1207_s22, %s1207_s22 }
  0x49   : > { %p872_p11 = scmp.ne.s32.totalorder %s1207_s22, %s871_s28  ;;  %p880_p3 = scmp.lt.s32.totalorder %s871_s28, %s871_s28 }
  0x4b   : > { %p874_p9 = pnand %p872_p11, %p860_p2  ;;  %p881_p4 = por %p880_p3, %p879_p8 }
  0x4d   : > { %p875_p10 = pneg %p874_p9 }
  0x4f   : > { %p882_p6 = pnand %p881_p4, %p875_p10 }
  0x51   : > { %885 = shalt.err (!%p882_p6)
}
  0x52   : > { %s1040_s19 = smov 64   ;;  %s1041_s1 = smov 4  }
  0x53   : > { %748 = dma.hbm_to_vmem [thread:$0]  (!%p1216_p1), %s1386_s0, 256, %s1207_s22, [#allocation3], %s1040_s19, %s1040_s19, %s1041_s1  }
  0x54   : > { %s886_s14 = scalar_lea.hbm %s1389_s3, 128 }
  0x55   : > { %p887_p9 = scmp.ne.s32.totalorder %s1389_s3, %s886_s14  ;;  %p893_p8 = scmp.lt.u32.totalorder %s886_s14, %s1389_s3 }
  0x57   : > { %p889_p11 = pnand %p887_p9, %p860_p2 }
  0x59   : > { %p890_p6 = pneg %p889_p11 }
  0x5b   : > { %p895_p10 = pnand %p893_p8, %p890_p6 }
  0x5d   : > { %898 = shalt.err (!%p895_p10)
}
  0x5e   : > { %s899_s22 = scalar_lea.vmem %s1220_s29, 128  ;;  %p907_p3 = scmp.lt.s32.totalorder %s1220_s29, %s1220_s29 }
  0x5f   : > { %p900_p5 = scmp.ne.s32.totalorder %s1220_s29, %s899_s22  ;;  %p908_p4 = scmp.lt.s32.totalorder %s899_s22, %s899_s22 }
  0x61   : > { %p902_p12 = pnand %p900_p5, %p860_p2  ;;  %p909_p9 = por %p908_p4, %p907_p3 }
  0x63   : > { %p903_p0 = pneg %p902_p12 }
  0x65   : > { %p910_p11 = pnand %p909_p9, %p903_p0 }
  0x67   : > { %913 = shalt.err (!%p910_p11)
}
  0x68   : > { %751 = dma.hbm_to_vmem [thread:$0]  (!%p1216_p1), %s1389_s3, 128, %s1220_s29, [#allocation9]  }
  0x69   : > { %s944_s19 = scalar_lea.hbm %s1174_s10, 64  ;;  %p1413_p6 = pneg %p1134_p7 }
  0x6a   : > { %p915_p2 = scmp.ne.s32.totalorder %s1212_s23, %s944_s19  ;;  %s919_s24 = scalar_lea.hbm %s1388_s2, 128 }
  0x6b   : > { %p920_p5 = scmp.lt.u32.totalorder %s1212_s23, %s1388_s2  ;;  %p921_p12 = scmp.lt.u32.totalorder %s919_s24, %s944_s19 }
  0x6c   : > { %p917_p8 = pnand %p915_p2, %p1413_p6  ;;  %p923_p3 = scmp.lt.u32.totalorder %s944_s19, %s1212_s23 }
  0x6d   : > { %p922_p0 = por %p921_p12, %p920_p5 }
  0x6e   : > { %p918_p10 = pneg %p917_p8 }
  0x6f   : > { %p924_p4 = por %p923_p3, %p922_p0 }
  0x71   : > { %p925_p9 = pnand %p924_p4, %p918_p10 }
  0x73   : > { %928 = shalt.err (!%p925_p9)
}
  0x74   : > { %s929_s10 = scalar_lea.vmem %s1223_s7, 32  ;;  %p1414_p11 = pmov %p1413_p6 }
  0x75   : > { %p930_p1 = scmp.ne.s32.totalorder %s1223_s7, %s929_s10  ;;  %s1042_s29 = smov [#allocation7]  }
  0x76   : > { %s934_s12 = sshll.u32 %s1042_s29, 4  ;;  %s935_s12 = int_to_ptr.vmem [resolvable:$false] %s934_s12 }
  0x77   : > { %p932_p2 = pnand %p930_p1, %p1414_p11  ;;  %s936_s14 = scalar_lea.vmem %s935_s12, 64 }
  0x78   : > { %p937_p8 = scmp.lt.s32.totalorder %s1223_s7, %s935_s12  ;;  %p938_p5 = scmp.lt.s32.totalorder %s936_s14, %s929_s10 }
  0x79   : > { %p933_p6 = pneg %p932_p2 }
  0x7a   : > { %p939_p12 = por %p938_p5, %p937_p8 }
  0x7c   : > { %p940_p0 = pnand %p939_p12, %p933_p6 }
  0x7e   : > { %943 = shalt.err (!%p940_p0)
}
  0x7f   : > { %758 = dma.hbm_to_vmem [thread:$0]  (!%p1134_p7), %s1212_s23, 32, %s1223_s7, %s1141_s9  }
  0x80   : > { %247 = sbr.rel (%p1203_p13) target bundleno = 514 (0x202), region = 36  ;;  %p1415_p10 = scmp.eq.s32.totalorder (!%p1203_p13), %s1177_s11, 0 }
  0x87   : > { %998 = dma.done.wait (%p1415_p10), [#allocation3], 256   ;;  %p1416_p3 = pmov %p1415_p10 }
  0x88   : > { %s253_s25 = sand.u32 1, %s1177_s11   ;;  %s1309_s28 = sand.u32 1, %s1019_s16  }
  0x89   : > { %1000 = vsyncadd (%p1416_p3), [#allocation3], 4294967040  ;;  %s685_s6 = sshll.u32 %s1309_s28, 1  ;;  %s254_s22 = scalar_lea.sflag [#allocation6], %s253_s25 }
  0x8a   : > { %s257_s17 = scalar_lea.vmem [#allocation5], %s685_s6  ;;  %p1417_p7 = scmp.ne.s32.totalorder %s1408_s5, 0 }
  0x8c   : > { %1002 = dma.done.wait (%p1417_p7), %s254_s22, 64  }
  0x8d   : > { %1004 = vsyncadd (%p1417_p7), %s254_s22, 4294967232  ;;  %s266_s9 = scalar_lea.vmem [#allocation7], %s685_s6  ;;  %p1418_p13 = pmov %p1416_p3 }
  0x8e   : > { %p1419_p4 = pmov %p1416_p3 }
  0x8f   : > { %1006 = dma.done.wait (%p1418_p13), [#allocation9], 128  }
  0x90   : > { %1008 = vsyncadd (%p1419_p4), [#allocation9], 4294967168  ;;  %v1043_v0 = vmov 0.0   ;;  %vm1044_vm0 = vmmov 0   ;;  %vm319_vm1 = vcmask 1041408   ;;  %s1045_s13 = smov 126  }
  0x91   : > { %707 = vmatprep.subr.bf16.mxu0 %v1043_v0  ;;  %713 = vmatprep.subr.bf16.mxu1 %v1043_v0  ;;  %v302_v1 = vld [vmem:[%s257_s17] sm:$0x3]  ;;  %s1046_s5 = smov 127   ;;  %v303_v3 = vld [vmem:[%s266_s9] sm:$0x3]  ;;  %vm315_vm2 = vcmask 31744  }
  0x92   : > { %709 = vmatprep.mubr.msk.bf16.mxu0 %vm1044_vm0, %v1043_v0  ;;  %715 = vmatprep.mubr.msk.bf16.mxu1 %vm1044_vm0, %v1043_v0  ;;  %v367_v2 = vsel %vm319_vm1, %v302_v1, 0  ;;  %v304_v4 = vld [vmem:[#allocation2] sm:$0xf]  ;;  %v1047_v5 = vmov 0   ;;  %s1048_s11 = smov 125   ;;  %v519_v6 = vld [vmem:[#allocation8] sm:$0xff] }
  0x93   : > { %411 = vrot.lane.b32.xlu1 %v302_v1, %s1045_s13  ;;  %309 = vrot.lane.b32.xlu0 %v302_v1, %s1046_s5  ;;  %vm313_vm3 = vcmask 1039360   ;;  %vm415_vm4 = vcmask 1031168   ;;  %vm470_vm5 = vcmask 1022976   ;;  %v306_v14 = vld [vmem:[#allocation2 + $0x4] sm:$0xf]  ;;  %s688_s23 = sshll.u32 %s1309_s28, 3 }
  0x94   : > { %714 = vmatpush3.bf16.msra.mxu1 %v367_v2  ;;  %827 = vset.pattern.permute.xlu0 %v1047_v5  ;;  %v465_v20 = vld [vmem:[#allocation2 + $0xc] sm:$0xf]  ;;  %v410_v21 = vld [vmem:[#allocation2 + $0x8] sm:$0xf]  ;;  %s694_s7 = sshll.u32 %s1027_s18, 7  ;;  %s299_s20 = scalar_lea.vmem [#allocation10], %s688_s23 }
  0x95   : > { %725 = vmatprep.subr.bf16.mxu1 %v1043_v0  ;;  %s545_s19 = sshll.u32 %s299_s20, 4  ;;  %s1337_s24 = scalar_lea.hbm %s1390_s4, %s694_s7  ;;  %s1339_s19 = int_to_ptr.vmem [resolvable:$true] %s545_s19 }
  0x96   : > { %s531_s27 = scalar_lea.sflag [#allocation4], %s1309_s28  ;;  %s945_s30 = scalar_lea.vmem %s1339_s19, 128 }
  0x97   : > { %413 = vrot.lane.b32.xlu1 %v303_v3, %s1045_s13  ;;  %311 = vrot.lane.b32.xlu0 %v303_v3, %s1046_s5  ;;  %p946_p9 = scmp.ne.s32.totalorder %s1339_s19, %s945_s30  ;;  %p1420_p1 = scmp.ne.s32.totalorder %s1409_s26, 0 }
  0x98   : > { %716 = vmatmul.mubr.msk.bf16.vlgmr.msra.gmra.mrb[0].mxu1 %vm315_vm2, %v304_v4  ;;  %s1049_s18 = smov [#allocation10]  }
  0x99   : > { %727 = vmatprep.mubr.msk.bf16.mxu1 %vm1044_vm0, %v1043_v0  ;;  %p947_p11 = pnand %p946_p9, %p1420_p1  ;;  %s949_s10 = sshll.u32 %s1049_s18, 4  ;;  %s950_s10 = int_to_ptr.vmem [resolvable:$false] %s949_s10 }
  0x9a   : > { %s951_s29 = scalar_lea.vmem %s950_s10, 256  ;;  %p952_p6 = scmp.lt.s32.totalorder %s1339_s19, %s950_s10 }
  0x9b   : > { %468 = vrot.lane.b32.xlu1 %v303_v3, %s1048_s11  ;;  %466 = vrot.lane.b32.xlu0 %v302_v1, %s1048_s11  ;;  %p948_p2 = pneg %p947_p11  ;;  %p953_p8 = scmp.lt.s32.totalorder %s951_s29, %s945_s30 }
  0x9d   : > { %p954_p5 = por %p953_p8, %p952_p6 }
  0x9f   : > { %522 = vperm.xlu0 %827, %v519_v6   ;;  %p955_p12 = pnand %p954_p5, %p948_p2 }
 0x105   : > { %v412_v7 = vpop.permute.xlu1 %411  ;;  %v310_v8 = vpop.permute.xlu0 %309 }
 0x109   : > { %v414_v9 = vpop.permute.xlu1 %413  ;;  %v312_v10 = vpop.permute.xlu0 %311 }
 0x10a   : > { %v314_v11 = vsel %vm313_vm3, %v310_v8, %v312_v10  ;;  %v416_v13 = vsel %vm415_vm4, %v412_v7, %v414_v9 }
 0x10b   : > { %v321_v12 = vsel %vm319_vm1, %v314_v11, 0  ;;  %v421_v18 = vsel %vm319_vm1, %v416_v13, 0 }
 0x10c   : > { %708 = vmatpush3.bf16.msra.mxu0 %v321_v12 }
 0x10d   : > { %v469_v15 = vpop.permute.xlu1 %468  ;;  %719 = vmatprep.subr.bf16.mxu0 %v1043_v0  ;;  %v467_v16 = vpop.permute.xlu0 %466 }
 0x10e   : > { %v471_v17 = vsel %vm470_vm5, %v467_v16, %v469_v15 }
 0x10f   : > { %710 = vmatmul.mubr.msk.bf16.vlgmr.msra.gmra.mrb[0].mxu0 %vm315_vm2, %v306_v14  ;;  %v476_v19 = vsel %vm319_vm1, %v471_v17, 0 }
 0x110   : > { %720 = vmatpush3.bf16.msra.mxu0 %v421_v18  ;;  %726 = vmatpush3.bf16.msra.mxu1 %v476_v19 }
 0x111   : > { %721 = vmatprep.mubr.msk.bf16.mxu0 %vm1044_vm0, %v1043_v0 }
 0x113   : > { %728 = vmatmul.mubr.msk.bf16.vlgmr.msra.gmra.mrb[4].mxu1 %vm315_vm2, %v465_v20 }
 0x117   : > { %722 = vmatmul.mubr.msk.bf16.vlgmr.msra.gmra.mrb[4].mxu0 %vm315_vm2, %v410_v21 }
 0x11e   : > { %v523_v39 = vpop.permute.xlu0 %522 }
 0x16b   : > { %v403_v22 = vpop.f32.mrb[0].mxu1 }
 0x16c   : > { %v717_v23 = vpop.f32.mrb[1].mxu1 }
 0x16d   : > { %v406_v24 = vpop.f32.mrb[2].mxu1 }
 0x16e   : > { %v718_v25 = vpop.f32.mrb[3].mxu1 }
 0x1e2   : > { %v357_v26 = vpop.f32.mrb[0].mxu0 }
 0x1e3   : > { %v404_v27 = vadd.f32 %v403_v22, %v357_v26  ;;  %v711_v28 = vpop.f32.mrb[1].mxu0 }
 0x1e4   : > { %v360_v29 = vpop.f32.mrb[2].mxu0 }
 0x1e5   : > { %v712_v30 = vpop.f32.mrb[3].mxu0 }
 0x1e6   : > { %v512_v31 = vpop.f32.mrb[4].mxu1 }
 0x1e7   : > { %v729_v32 = vpop.f32.mrb[5].mxu1 }
 0x1e8   : > { %v515_v33 = vpop.f32.mrb[6].mxu1 }
 0x1e9   : > { %v730_v34 = vpop.f32.mrb[7].mxu1 }
 0x1ea   : > { %v457_v35 = vpop.f32.mrb[4].mxu0 }
 0x1eb   : > { %v463_v36 = vadd.f32 %v457_v35, %v404_v27  ;;  %v723_v37 = vpop.f32.mrb[5].mxu0 }
 0x1ec   : > { %v460_v38 = vpop.f32.mrb[6].mxu0 }
 0x1ed   : > { %v518_v40 = vadd.f32 %v512_v31, %v463_v36  ;;  %v724_v41 = vpop.f32.mrb[7].mxu0 }
 0x1ef   : > { %v525_v42 = vadd.f32 %v523_v39, %v518_v40 }
 0x1f1   : > { %vm526_vm6 = vcmp.ge.f32.partialorder %v525_v42, 0.0  ;;  %v527_v43 = vmul.f32 0.2, %v525_v42 }
 0x1f3   : > { %v528_v44 = vsel %vm526_vm6, %v525_v42, %v527_v43 }
 0x1f4   : > { %529 = vst [vmem:[%s299_s20] sm:$0xff] %v528_v44 }
 0x1f5   : > { %958 = shalt.err (!%p955_p12)
}
 0x1f6   : > { %s959_s12 = scalar_lea.hbm %s1337_s24, 128  ;;  %s963_s28 = scalar_lea.hbm %s1390_s4, 256 }
 0x1f7   : > { %p960_p0 = scmp.ne.s32.totalorder %s1337_s24, %s959_s12  ;;  %p964_p7 = scmp.lt.u32.totalorder %s1337_s24, %s1390_s4 }
 0x1f8   : > { %p965_p13 = scmp.lt.u32.totalorder %s963_s28, %s959_s12  ;;  %p967_p9 = scmp.lt.u32.totalorder %s959_s12, %s1337_s24 }
 0x1f9   : > { %p961_p10 = pnand %p960_p0, %p1420_p1 }
 0x1fa   : > { %p966_p4 = por %p965_p13, %p964_p7 }
 0x1fb   : > { %p962_p3 = pneg %p961_p10 }
 0x1fc   : > { %p968_p11 = por %p967_p9, %p966_p4 }
 0x1fe   : > { %p969_p2 = pnand %p968_p11, %p962_p3 }
 0x200   : > { %972 = shalt.err (!%p969_p2)
}
 0x201   : > { %743 = dma.vmem_to_hbm [thread:$0]  (%p1420_p1), %s1339_s19, 128, %s1337_s24, %s531_s27  }
 0x202 PF: > { %s1421_s17 = sld [smem:[#allocation17_spill]]  ;;  %s557_s9 = sand.u32 1, %s1015_s15  }
 0x203   : > { %p1422_p6 = scmp.ne.s32.totalorder %s1410_s8, 0  ;;  %s558_s13 = scalar_lea.sflag [#allocation4], %s557_s9 }
 0x208   : > { %p1423_p8 = scmp.ge.s32.totalorder %s1421_s17, 2 }
 0x20a   : > { %p760_p5 = pnand %p1423_p8, %p1422_p6 }
 0x20c   : > { %1010 = dma.done.wait (!%p760_p5), %s558_s13, 128  }
 0x20d   : > { %1012 = vsyncadd (!%p760_p5), %s558_s13, 4294967168  ;;  %s22_s20 = sadd.s32 1, %s1421_s17   ;;  %s1424_s5 = sld [smem:[#allocation15_spill]] }
 0x20e   : > { %p19_p12 = scmp.ge.s32.totalorder %s22_s20, 4   ;;  %s1425_s17 = sld [smem:[#allocation19_spill]] }
 0x20f   : > { %s1426_s18 = sld [smem:[#allocation16_spill]]  ;;  %s1427_s19 = sld [smem:[#allocation18_spill]] }
 0x210   : > { %s1428_s15 = smov %s1019_s16  ;;  %21 = sbr.rel (!%p19_p12) target bundleno = 10 (0xa), region = 104 }
 0x213   : > { %s1429_s16 = smov %s1424_s5 }
 0x217   :  { %563 = vsyncpa [#allocation3], 1 }
 0x218   :  { %565 = vsyncpa [#allocation3 + $0x1], 1 }
 0x219   :  { %566 = vsyncpa [#allocation6], 1 }
 0x21a   :  { %568 = vsyncpa [#allocation6 + $0x1], 1 }
 0x21b   :  { %569 = vsyncpa [#allocation9], 1 }
 0x21c   :  { %570 = vsyncpa [#allocation4], 1 }
 0x21d   :  { %572 = vsyncpa [#allocation4 + $0x1], 1 }

</bundles_post_ra>
